<compile_context>
chip_gen: v7x
topology: tpu7x:2x2x1
jax: 0.10.0
libtpu: 0.0.40
codegen_flags: <defaults>
</compile_context>

<pallas_src>
import functools

import jax
import jax.numpy as jnp
from jax.experimental import pallas as pl
from jax.experimental.pallas import tpu as pltpu


def _cel_kernel(logits_ref, labels_ref, out_ref, acc_ref, cnt_ref, *,
                ignore_index):
    b = pl.program_id(0)
    p = pl.program_id(1)

    @pl.when(jnp.logical_and(b == 0, p == 0))
    def _():
        acc_ref[...] = jnp.zeros_like(acc_ref)
        cnt_ref[...] = jnp.zeros_like(cnt_ref)

    x = logits_ref[0].astype(jnp.float32)          # (C, T): classes on sublanes
    lbl = labels_ref[0]                            # (1, T): lane-dense labels

    # Fused, numerically-stable NLL:  nll = (m - x[lbl]) + log(sum(exp(x - m)))
    m = jnp.max(x, axis=0, keepdims=True)                          # (1, T)
    s = jnp.sum(jnp.exp(x - m), axis=0, keepdims=True)             # (1, T) EUP exp
    cls = jax.lax.broadcasted_iota(jnp.int32, x.shape, 0)          # (C, T)
    tgt = jnp.sum(jnp.where(cls == lbl, x, 0.0),
                  axis=0, keepdims=True)                           # (1, T)

    valid = lbl != ignore_index                                    # (1, T)
    nll = (m - tgt) + jnp.log(s)                                   # (1, T)

    acc_ref[...] += jnp.where(valid, nll, 0.0)
    cnt_ref[...] += valid.astype(jnp.float32)

    @pl.when(jnp.logical_and(b == pl.num_programs(0) - 1,
                             p == pl.num_programs(1) - 1))
    def _():
        out_ref[0, 0] = jnp.sum(acc_ref[...]) / jnp.sum(cnt_ref[...])


def _choose_tile_p(hw, c, itemsize, *, target_block_bytes=2 << 20,
                   max_tile=32768):
    """Largest multiple-of-128 divisor of hw whose logits block fits budget."""
    assert hw % 128 == 0
    n128 = hw // 128
    best = 128
    for k in range(1, n128 + 1):
        if n128 % k != 0:
            continue
        t = 128 * k
        if t > max_tile:
            break
        if t * c * itemsize <= target_block_bytes:
            best = t
    return best


def cel_loss(logits_nchw, labels_nhw, *, ignore_index=-100):
    """Cross-entropy loss (mean over non-ignored pixels), matching
    F.cross_entropy(mean, label) defaults.

    logits_nchw: (N, C, H, W) float
    labels_nhw:  (N, H, W) int
    returns: scalar float32 loss
    """
    n, c, h, w = logits_nchw.shape
    hw = h * w

    # Native layout (no transpose): classes on sublanes, pixels on lanes.
    logits_3d = logits_nchw.reshape(n, c, hw)
    labels_3d = labels_nhw.reshape(n, 1, hw).astype(jnp.int32)

    # Pad pixel axis to a multiple of 128; padded pixels are ignored.
    if hw % 128 != 0:
        pad = 128 - hw % 128
        logits_3d = jnp.pad(logits_3d, ((0, 0), (0, 0), (0, pad)))
        labels_3d = jnp.pad(labels_3d, ((0, 0), (0, 0), (0, pad)),
                            constant_values=ignore_index)
        hw += pad

    itemsize = jnp.dtype(logits_3d.dtype).itemsize
    tile_p = _choose_tile_p(hw, c, itemsize)
    grid = (n, hw // tile_p)

    kernel = functools.partial(_cel_kernel, ignore_index=ignore_index)

    out = pl.pallas_call(
        kernel,
        out_shape=jax.ShapeDtypeStruct((1, 1), jnp.float32),
        grid_spec=pltpu.PrefetchScalarGridSpec(
            num_scalar_prefetch=0,
            grid=grid,
            in_specs=[
                pl.BlockSpec((1, c, tile_p), lambda b, p: (b, 0, p)),
                pl.BlockSpec((1, 1, tile_p), lambda b, p: (b, 0, p)),
            ],
            out_specs=pl.BlockSpec((1, 1), lambda b, p: (0, 0),
                                   memory_space=pltpu.SMEM),
            scratch_shapes=[
                pltpu.VMEM((1, tile_p), jnp.float32),   # nll partial sums
                pltpu.VMEM((1, tile_p), jnp.float32),   # valid-pixel counts
            ],
        ),
        compiler_params=pltpu.CompilerParams(
            dimension_semantics=("arbitrary", "arbitrary"),
            vmem_limit_bytes=32 * 1024 * 1024,
        ),
    )(logits_3d, labels_3d)
    return out[0, 0]


def _cel_reference(logits_nchw, labels_nhw, ignore_index=-100):
    """Pure-JAX reference identical to F.cross_entropy(mean, label)."""
    n, c, h, w = logits_nchw.shape
    x = jnp.transpose(logits_nchw, (0, 2, 3, 1)).reshape(-1, c).astype(jnp.float32)
    y = labels_nhw.reshape(-1).astype(jnp.int32)
    valid = y != ignore_index
    y_safe = jnp.where(valid, y, 0)
    logp = jax.nn.log_softmax(x, axis=-1)
    nll = -jnp.take_along_axis(logp, y_safe[:, None], axis=-1)[:, 0]
    return jnp.sum(jnp.where(valid, nll, 0.0)) / jnp.sum(valid)


if __name__ == "__main__":
    key = jax.random.PRNGKey(0)
    k1, k2 = jax.random.split(key)

    N, C, H, W = 2, 4, 16, 16
    logits = jax.random.normal(k1, (N, C, H, W), dtype=jnp.float32)
    labels = jax.random.randint(k2, (N, H, W), 0, C, dtype=jnp.int32)

    results = {"mean": logits}  # mirrors the PyTorch module's dict input

    loss = cel_loss(results["mean"], labels)
    loss = jax.block_until_ready(loss)

    ref = jax.block_until_ready(_cel_reference(results["mean"], labels))
    assert jnp.allclose(loss, ref, atol=1e-5, rtol=1e-5), (loss, ref)

    print("KERNEL_OK")
</pallas_src>

<mosaic_0001>
module attributes {stable_mosaic.version = 11 : i64} {
  func.func @_cel_kernel(%arg0: i32, %arg1: i32, %arg2: memref<1x4x256xf32, #tpu.memory_space<vmem>>, %arg3: memref<1x1x256xi32, #tpu.memory_space<vmem>>, %arg4: memref<1x1xf32, #tpu.memory_space<smem>>, %arg5: memref<1x256xf32, #tpu.memory_space<vmem>>, %arg6: memref<1x256xf32, #tpu.memory_space<vmem>>) attributes {dimension_semantics = [#tpu.dimension_semantics<arbitrary>, #tpu.dimension_semantics<arbitrary>], iteration_bounds = array<i64: 2, 1>, scalar_prefetch = 0 : i64, scratch_operands = 2 : i64, tpu.core_type = #tpu.core_type<tc>, window_params = [{transform_indices = @transform_0, window_bounds = array<i64: 1, 4, 256>}, {transform_indices = @transform_1, window_bounds = array<i64: 1, 1, 256>}, {transform_indices = @transform_2, window_bounds = array<i64: 1, 1>}]} {
    %c0_i32 = arith.constant 0 : i32
    %0 = arith.cmpi eq, %arg0, %c0_i32 : i32
    %c0_i32_0 = arith.constant 0 : i32
    %1 = arith.cmpi eq, %arg1, %c0_i32_0 : i32
    %2 = arith.andi %0, %1 : i1
    %3 = arith.extui %2 : i1 to i32
    %c0_i32_1 = arith.constant 0 : i32
    %4 = arith.cmpi ne, %3, %c0_i32_1 : i32
    scf.if %4 {
      %cst_21 = arith.constant 0.000000e+00 : f32
      %43 = vector.broadcast %cst_21 : f32 to vector<1x256xf32>
      %c0_22 = arith.constant 0 : index
      %c0_23 = arith.constant 0 : index
      %44 = vector.load %arg5[%c0_22, %c0_23] : memref<1x256xf32, #tpu.memory_space<vmem>>, vector<1x256xf32>
      tpu.vector_store %arg5[%c0_22, %c0_23], %43 {strides = array<i32>} : memref<1x256xf32, #tpu.memory_space<vmem>>, vector<1x256xf32>,
      %cst_24 = arith.constant 0.000000e+00 : f32
      %45 = vector.broadcast %cst_24 : f32 to vector<1x256xf32>
      %c0_25 = arith.constant 0 : index
      %c0_26 = arith.constant 0 : index
      %46 = vector.load %arg6[%c0_25, %c0_26] : memref<1x256xf32, #tpu.memory_space<vmem>>, vector<1x256xf32>
      tpu.vector_store %arg6[%c0_25, %c0_26], %45 {strides = array<i32>} : memref<1x256xf32, #tpu.memory_space<vmem>>, vector<1x256xf32>,
    } else {
    }
    %c0 = arith.constant 0 : index
    %c0_2 = arith.constant 0 : index
    %c0_3 = arith.constant 0 : index
    %5 = vector.load %arg2[%c0, %c0_2, %c0_3] : memref<1x4x256xf32, #tpu.memory_space<vmem>>, vector<1x4x256xf32>
    %6 = vector.shape_cast %5 : vector<1x4x256xf32> to vector<4x256xf32>
    %c0_4 = arith.constant 0 : index
    %c0_5 = arith.constant 0 : index
    %c0_6 = arith.constant 0 : index
    %7 = vector.load %arg3[%c0_4, %c0_5, %c0_6] : memref<1x1x256xi32, #tpu.memory_space<vmem>>, vector<1x1x256xi32>
    %8 = vector.shape_cast %7 : vector<1x1x256xi32> to vector<1x256xi32>
    %cst = arith.constant dense<0xFF800000> : vector<256xf32>
    %9 = vector.multi_reduction <maximumf>, %6, %cst [0] : vector<4x256xf32> to vector<256xf32>
    %10 = vector.shape_cast %9 : vector<256xf32> to vector<1x256xf32>
    %11 = vector.broadcast %10 : vector<1x256xf32> to vector<4x256xf32>
    %12 = arith.subf %6, %11 : vector<4x256xf32>
    %13 = math.exp %12 : vector<4x256xf32>
    %cst_7 = arith.constant dense<0.000000e+00> : vector<256xf32>
    %14 = vector.multi_reduction <add>, %13, %cst_7 [0] : vector<4x256xf32> to vector<256xf32>
    %15 = vector.shape_cast %14 : vector<256xf32> to vector<1x256xf32>
    %16 = tpu.iota {dimensions = array<i32: 0>} : vector<4x256xi32>
    %17 = vector.broadcast %8 : vector<1x256xi32> to vector<4x256xi32>
    %18 = arith.cmpi eq, %16, %17 : vector<4x256xi32>
    %cst_8 = arith.constant 0.000000e+00 : f32
    %19 = vector.broadcast %cst_8 : f32 to vector<4x256xf32>
    %20 = arith.select %18, %6, %19 : vector<4x256xi1>, vector<4x256xf32>
    %cst_9 = arith.constant dense<0.000000e+00> : vector<256xf32>
    %21 = vector.multi_reduction <add>, %20, %cst_9 [0] : vector<4x256xf32> to vector<256xf32>
    %22 = vector.shape_cast %21 : vector<256xf32> to vector<1x256xf32>
    %c-100_i32 = arith.constant -100 : i32
    %23 = vector.broadcast %c-100_i32 : i32 to vector<1x256xi32>
    %24 = arith.cmpi ne, %8, %23 : vector<1x256xi32>
    %25 = arith.subf %10, %22 : vector<1x256xf32>
    %26 = math.log %15 : vector<1x256xf32>
    %27 = arith.addf %25, %26 : vector<1x256xf32>
    %c0_10 = arith.constant 0 : index
    %c0_11 = arith.constant 0 : index
    %28 = vector.load %arg5[%c0_10, %c0_11] : memref<1x256xf32, #tpu.memory_space<vmem>>, vector<1x256xf32>
    %cst_12 = arith.constant 0.000000e+00 : f32
    %29 = vector.broadcast %cst_12 : f32 to vector<1x256xf32>
    %30 = arith.select %24, %27, %29 : vector<1x256xi1>, vector<1x256xf32>
    %31 = arith.addf %28, %30 : vector<1x256xf32>
    %c0_13 = arith.constant 0 : index
    %c0_14 = arith.constant 0 : index
    %32 = vector.load %arg5[%c0_13, %c0_14] : memref<1x256xf32, #tpu.memory_space<vmem>>, vector<1x256xf32>
    tpu.vector_store %arg5[%c0_13, %c0_14], %31 {strides = array<i32>} : memref<1x256xf32, #tpu.memory_space<vmem>>, vector<1x256xf32>,
    %c0_15 = arith.constant 0 : index
    %c0_16 = arith.constant 0 : index
    %33 = vector.load %arg6[%c0_15, %c0_16] : memref<1x256xf32, #tpu.memory_space<vmem>>, vector<1x256xf32>
    %34 = arith.extui %24 : vector<1x256xi1> to vector<1x256xi32>
    %35 = arith.sitofp %34 : vector<1x256xi32> to vector<1x256xf32>
    %36 = arith.addf %33, %35 : vector<1x256xf32>
    %c0_17 = arith.constant 0 : index
    %c0_18 = arith.constant 0 : index
    %37 = vector.load %arg6[%c0_17, %c0_18] : memref<1x256xf32, #tpu.memory_space<vmem>>, vector<1x256xf32>
    tpu.vector_store %arg6[%c0_17, %c0_18], %36 {strides = array<i32>} : memref<1x256xf32, #tpu.memory_space<vmem>>, vector<1x256xf32>,
    %c1_i32 = arith.constant 1 : i32
    %38 = arith.cmpi eq, %arg0, %c1_i32 : i32
    %c0_i32_19 = arith.constant 0 : i32
    %39 = arith.cmpi eq, %arg1, %c0_i32_19 : i32
    %40 = arith.andi %38, %39 : i1
    %41 = arith.extui %40 : i1 to i32
    %c0_i32_20 = arith.constant 0 : i32
    %42 = arith.cmpi ne, %41, %c0_i32_20 : i32
    scf.if %42 {
      %c0_21 = arith.constant 0 : index
      %c0_22 = arith.constant 0 : index
      %43 = vector.load %arg5[%c0_21, %c0_22] : memref<1x256xf32, #tpu.memory_space<vmem>>, vector<1x256xf32>
      %44 = vector.shape_cast %43 : vector<1x256xf32> to vector<1x1x256xf32>
      %cst_23 = arith.constant dense<0.000000e+00> : vector<1xf32>
      %45 = vector.multi_reduction <add>, %44, %cst_23 [1, 2] : vector<1x1x256xf32> to vector<1xf32>
      %46 = vector.shape_cast %45 : vector<1xf32> to vector<1x1x1xf32>
      %47 = vector.extract %46[0, 0, 0] : f32 from vector<1x1x1xf32>
      %c0_24 = arith.constant 0 : index
      %c0_25 = arith.constant 0 : index
      %48 = vector.load %arg6[%c0_24, %c0_25] : memref<1x256xf32, #tpu.memory_space<vmem>>, vector<1x256xf32>
      %49 = vector.shape_cast %48 : vector<1x256xf32> to vector<1x1x256xf32>
      %cst_26 = arith.constant dense<0.000000e+00> : vector<1xf32>
      %50 = vector.multi_reduction <add>, %49, %cst_26 [1, 2] : vector<1x1x256xf32> to vector<1xf32>
      %51 = vector.shape_cast %50 : vector<1xf32> to vector<1x1x1xf32>
      %52 = vector.extract %51[0, 0, 0] : f32 from vector<1x1x1xf32>
      %53 = arith.divf %47, %52 : f32
      %c0_27 = arith.constant 0 : index
      %c0_28 = arith.constant 0 : index
      %54 = memref.load %arg4[%c0_27, %c0_28] : memref<1x1xf32, #tpu.memory_space<smem>>
      memref.store %53, %arg4[%c0_27, %c0_28] : memref<1x1xf32, #tpu.memory_space<smem>>
    } else {
    }
    return
  }
  func.func @transform_0(%arg0: i32, %arg1: i32) -> (i32, i32, i32) {
    %c0_i32 = arith.constant 0 : i32
    %c0_i32_0 = arith.constant 0 : i32
    return %arg0, %c0_i32, %arg1 : i32, i32, i32
  }
  func.func @transform_1(%arg0: i32, %arg1: i32) -> (i32, i32, i32) {
    %c0_i32 = arith.constant 0 : i32
    %c0_i32_0 = arith.constant 0 : i32
    return %arg0, %c0_i32, %arg1 : i32, i32, i32
  }
  func.func @transform_2(%arg0: i32, %arg1: i32) -> (i32, i32) {
    %c0_i32 = arith.constant 0 : i32
    %c0_i32_0 = arith.constant 0 : i32
    %c0_i32_1 = arith.constant 0 : i32
    return %c0_i32, %c0_i32_0 : i32, i32
  }
}

</mosaic_0001>

<bundles_post_ra>
// kernel: tpu_custom_call.1
= control target key start
LH: loop header
LB: loop body
LE: loop exit
PB: predicated region body
PF: predicated region fallthrough
CT: control target
= control target key end

     0   :  { %7 = vsyncpa [#allocation5], 0  ;;  %s961_s0 = inlined_call_operand.hbm [shape: f32[2,4,256], index: 0, kind: input, shape index: {}]   ;;  %s962_s1 = inlined_call_operand.hbm [shape: s32[2,1,256], index: 1, kind: input, shape index: {}]   ;;  %s963_s2 = inlined_call_operand.hbm [shape: f32[1,1], index: 2, kind: output, shape index: {}]  }
   0x1   :  { %9 = vsyncpa [#allocation5 + $0x1], 0 }
   0x2   :  { %10 = vsyncpa [#allocation8], 0 }
   0x3   :  { %12 = vsyncpa [#allocation8 + $0x1], 0 }
   0x4   :  { %13 = vsyncpa [#allocation6], 0  ;;  %s747_s9 = smov 0   ;;  %s749_s10 = smov 0  }
   0x5   :  { %s751_s11 = smov 0   ;;  %s753_s12 = smov 0  }
   0x6   :  { %s755_s13 = smov 0   ;;  %s757_s14 = smov 0  }
   0x7 LB: > { %s486_s15 = sadd.s32 4294967295, %s724_s14   ;;  %s31_s16 = sadd.s32 1, %s720_s13  ;;  %s724_s14 = sphi %s757_s14, %s19_s14   ;;  %s720_s13 = sphi %s755_s13, %s979_s13   ;;  %s716_s12 = sphi %s753_s12, %s978_s12   ;;  %s712_s11 = sphi %s751_s11, %s977_s11   ;;  %s708_s10 = sphi %s749_s10, %s976_s10   ;;  %s704_s9 = sphi %s747_s9, %s975_s9  }
   0x8   : > { %p33_p0 = scmp.ge.s32.totalorder %s31_s16, 2  ;;  %s40_s17 = sadd.s32 1, %s712_s11 }
   0x9   : > { %p47_p1 = scmp.ne.s32.totalorder %s712_s11, %s708_s10  ;;  %p48_p2 = scmp.eq.s32.totalorder %s724_s14, 0 }
   0xa   : > { %s981_s16 = smov (%p33_p0, %s31_s16), 0  ;;  %p53_p4 = scmp.ne.s32.totalorder %s708_s10, %s704_s9 }
   0xb   : > { %p783_p3 = por %p48_p2, %p47_p1  ;;  %s35_s19 = ssub.s32 %s720_s13, %s981_s16 }
   0xc   : > { %p54_p5 = scmp.eq.s32.totalorder %s486_s15, 0  ;;  %p38_p6 = scmp.eq.s32.totalorder %s35_s19, 0 }
   0xd   : > { %p530_p8 = scmp.lt.s32.totalorder %s724_s14, 2  ;;  %s801_s22 = sand.u32 1, %s712_s11  }
   0xe   : > { %p792_p7 = por %p54_p5, %p53_p4  ;;  %s505_s23 = sshll.u32 %s720_s13, 7 }
   0xf   : > { %s798_s21 = scalar_select %p38_p6, %s712_s11, %s40_s17  }
  0x10   : > { %s966_s20 = scalar_select %p792_p7, 1, 0 }
  0x11   : > { %s489_s24 = sshll.u32 %s801_s22, 3  ;;  %s808_s27 = scalar_lea.hbm %s961_s0, %s505_s23 }
  0x12   : > { %s130_s28 = scalar_lea.vmem [#allocation4], %s489_s24  ;;  %p812_p9 = pnand %p530_p8, %p783_p3 }
  0x13   : > { %s140_s29 = sshll.u32 %s130_s28, 4  ;;  %s127_s3 = scalar_lea.sflag [#allocation5], %s801_s22  ;;  %s816_s29 = int_to_ptr.vmem [resolvable:$true] %s140_s29 }
  0x14   : > { %s594_s4 = scalar_lea.hbm %s808_s27, 128  ;;  %p596_p13 = pneg %p812_p9 }
  0x15   : > { %p595_p12 = scmp.ne.s32.totalorder %s808_s27, %s594_s4  ;;  %s599_s7 = scalar_lea.hbm %s961_s0, 256 }
  0x16   : > { %p600_p2 = scmp.lt.u32.totalorder %s808_s27, %s961_s0  ;;  %p601_p3 = scmp.lt.u32.totalorder %s599_s7, %s594_s4 }
  0x17   : > { %p597_p0 = pnand %p596_p13, %p595_p12  ;;  %p603_p5 = scmp.lt.u32.totalorder %s594_s4, %s808_s27 }
  0x18   : > { %p602_p4 = por %p601_p3, %p600_p2 }
  0x19   : > { %p598_p1 = pneg %p597_p0 }
  0x1a   : > { %p604_p6 = por %p603_p5, %p602_p4 }
  0x1c   : > { %p605_p8 = pnand %p604_p6, %p598_p1 }
  0x1e   : > { %608 = shalt.err (!%p605_p8)
}
  0x1f   : > { %s609_s17 = scalar_lea.vmem %s816_s29, 128  ;;  %s726_s18 = smov [#allocation4]  }
  0x20   : > { %p610_p12 = scmp.ne.s32.totalorder %s816_s29, %s609_s17  ;;  %s614_s19 = sshll.u32 %s726_s18, 4  ;;  %s615_s19 = int_to_ptr.vmem [resolvable:$false] %s614_s19 }
  0x21   : > { %s616_s23 = scalar_lea.vmem %s615_s19, 256  ;;  %p617_p11 = scmp.lt.s32.totalorder %s816_s29, %s615_s19 }
  0x22   : > { %p612_p0 = pnand %p610_p12, %p596_p13  ;;  %p618_p2 = scmp.lt.s32.totalorder %s616_s23, %s609_s17 }
  0x24   : > { %p613_p10 = pneg %p612_p0  ;;  %p619_p3 = por %p618_p2, %p617_p11 }
  0x26   : > { %p620_p4 = pnand %p619_p3, %p613_p10 }
  0x28   : > { %623 = shalt.err (!%p620_p4)
}
  0x29   : > { %526 = dma.hbm_to_vmem [thread:$0]  (!%p812_p9), %s808_s27, 128, %s816_s29, %s127_s3  }
  0x2a   : > { %p968_p1 = scmp.lt.s32.totalorder %s724_s14, 3  ;;  %p969_p5 = scmp.ge.s32.totalorder %s724_s14, 1 }
  0x2b   : > { %s492_s25 = sshll.u32 %s801_s22, 1  ;;  %s506_s26 = sshll.u32 %s720_s13, 5 }
  0x2c   : > { %p850_p6 = pnand %p969_p5, %p968_p1  ;;  %s859_s5 = scalar_lea.hbm %s962_s1, %s506_s26 }
  0x2d   : > { %s151_s6 = scalar_lea.vmem [#allocation7], %s492_s25  ;;  %s148_s27 = scalar_lea.sflag [#allocation8], %s801_s22 }
  0x2e   : > { %s970_s24 = scalar_select %p850_p6, 1, 0 }
  0x2f   : > { %s161_s7 = sshll.u32 %s151_s6, 4  ;;  %s624_s29 = scalar_lea.hbm %s859_s5, 32  ;;  %s162_s7 = int_to_ptr.vmem [resolvable:$true] %s161_s7 }
  0x30   : > { %p625_p10 = scmp.ne.s32.totalorder %s859_s5, %s624_s29  ;;  %s629_s9 = scalar_lea.hbm %s962_s1, 64 }
  0x31   : > { %p630_p12 = scmp.lt.u32.totalorder %s859_s5, %s962_s1  ;;  %p631_p0 = scmp.lt.u32.totalorder %s629_s9, %s624_s29 }
  0x32   : > { %p627_p11 = pnand %p625_p10, %p596_p13  ;;  %p633_p3 = scmp.lt.u32.totalorder %s624_s29, %s859_s5 }
  0x33   : > { %p632_p2 = por %p631_p0, %p630_p12 }
  0x34   : > { %p628_p8 = pneg %p627_p11 }
  0x35   : > { %p634_p4 = por %p633_p3, %p632_p2 }
  0x37   : > { %p635_p1 = pnand %p634_p4, %p628_p8 }
  0x39   : > { %638 = shalt.err (!%p635_p1)
}
  0x3a   : > { %s639_s22 = scalar_lea.vmem %s162_s7, 32  ;;  %s727_s19 = smov [#allocation7]  }
  0x3b   : > { %p640_p5 = scmp.ne.s32.totalorder %s162_s7, %s639_s22  ;;  %s644_s23 = sshll.u32 %s727_s19, 4  ;;  %s645_s23 = int_to_ptr.vmem [resolvable:$false] %s644_s23 }
  0x3c   : > { %s646_s25 = scalar_lea.vmem %s645_s23, 64  ;;  %p647_p7 = scmp.lt.s32.totalorder %s162_s7, %s645_s23 }
  0x3d   : > { %p642_p10 = pnand %p640_p5, %p596_p13  ;;  %p648_p6 = scmp.lt.s32.totalorder %s646_s25, %s639_s22 }
  0x3f   : > { %p643_p11 = pneg %p642_p10  ;;  %p649_p0 = por %p648_p6, %p647_p7 }
  0x41   : > { %p650_p12 = pnand %p649_p0, %p643_p11 }
  0x43   : > { %653 = shalt.err (!%p650_p12)
}
  0x44   : > { %529 = dma.hbm_to_vmem [thread:$0]  (!%p812_p9), %s859_s5, 32, %s162_s7, %s148_s27  }
  0x45   : > { %p971_p8 = scmp.ne.s32.totalorder %s970_s24, 0 }
  0x46   : > { %s172_s26 = sand.u32 (!%p971_p8), 1, %s708_s10   ;;  %p972_p13 = scmp.ne.s32.totalorder (!%p971_p8), %s966_s20, 0 }
  0x47   : > { %170 = sbr.rel (%p971_p8) target bundleno = 464 (0x1d0), region = 28  ;;  %s496_s28 = sshll.u32 (!%p971_p8), %s172_s26, 3 }
  0x48   : > { %s173_s4 = scalar_lea.sflag (!%p971_p8), [#allocation5], %s172_s26  ;;  %s176_s6 = scalar_lea.vmem (!%p971_p8), [#allocation4], %s496_s28 }
  0x4e   : > { %691 = dma.done.wait (%p972_p13), %s173_s4, 128  }
  0x4f   : > { %693 = vsyncadd (%p972_p13), %s173_s4, 4294967168  ;;  %s497_s29 = sshll.u32 %s172_s26, 1  ;;  %s182_s3 = scalar_lea.sflag [#allocation8], %s172_s26 }
  0x50   : > { %s185_s30 = scalar_lea.vmem [#allocation7], %s497_s29 }
  0x51   : > { %695 = dma.done.wait (%p972_p13), %s182_s3, 32  }
  0x52   : > { %697 = vsyncadd (%p972_p13), %s182_s3, 4294967264  ;;  %p208_p7 = scmp.eq.s32.totalorder %s716_s12, 0 }
  0x53   : > { %v214_v0 = vlaneseq (%p208_p7)  ;;  %v728_v1 = vmov (%p208_p7), 0.0  }
  0x54   : > { %213 = sbr.rel (!%p208_p7) target bundleno = 91 (0x5b), region = 40 }
  0x55   : > { %vm216_vm0 = vcmp.lt.s32.totalorder (%p208_p7), %v214_v0, 256 }
  0x56   : > { %218 = vst.msk [vmem:[#allocation2] sm:$0x3] (%p208_p7), %vm216_vm0, %v728_v1  ;;  %219 = vst.msk [vmem:[#allocation3] sm:$0x3] (%p208_p7), %vm216_vm0, %v728_v1 }
  0x5b PF: > { %v220_v2 = vld [vmem:[%s176_s6] sm:$0xff]  ;;  %vm225_vm1 = vcmask 1043456   ;;  %v893_v3 = vld [vmem:[%s185_s30] sm:$0x3]  ;;  %p332_p9 = scmp.eq.s32.totalorder %s716_s12, 1  ;;  %v264_v10 = vlaneseq  ;;  %v729_v12 = vmov 0.0  }
  0x5c   : > { %v223_v4 = vcombine.high %v220_v2, %v220_v2  ;;  %v226_v5 = vsel %vm225_vm1, %v220_v2, -inf  ;;  %vm292_vm2 = vcmp.ne.s32.totalorder %v893_v3, 4294967196  ;;  %v730_v1 = vmov 1966171168  }
  0x5d   : > { %v227_v6 = vrot.slane %v226_v5, 4  ;;  %v327_v11 = vld [vmem:[#allocation3] sm:$0x3]  ;;  %v499_v13 = vsel %vm292_vm2, 1.0, %v729_v12  ;;  %vm901_vm3 = vcmp.lt.s32.totalorder %v264_v10, 256  ;;  %v265_v22 = vshrl.u32 %v264_v10, 7 }
  0x5e   : > { %v233_v7 = vsel %vm225_vm1, %v223_v4, -inf  ;;  %v330_v17 = vadd.f32 %v499_v13, %v327_v11  ;;  %vm349_vm6 = vcmask (%p332_p9), 1040384  }
  0x5f   : > { %v228_v8 = vmax.f32 %v226_v5, %v227_v6  ;;  %v234_v9 = vrot.slane %v233_v7, 4  ;;  %v907_v26 = vsub.s32 0, %v265_v22  ;;  %v909_v28 = vsub.s32 1, %v265_v22 }
  0x60   : > { %331 = vst.msk [vmem:[#allocation3] sm:$0x3] %vm901_vm3, %v330_v17  ;;  %v301_v17 = vld [vmem:[#allocation2] sm:$0x3] }
  0x61   : > { %v229_v14 = vrot.slane %v228_v8, 2  ;;  %v235_v15 = vmax.f32 %v233_v7, %v234_v9  ;;  %v269_v30 = vrot.slane %v893_v3, %v907_v26  ;;  %v273_v32 = vrot.slane %v893_v3, %v909_v28 }
  0x63   : > { %v230_v18 = vmax.f32 %v228_v8, %v229_v14  ;;  %v236_v19 = vrot.slane %v235_v15, 2  ;;  %vm274_vm4 = vcmp.eq.s32.totalorder %v265_v22, %v269_v30  ;;  %vm275_vm5 = vcmp.eq.s32.totalorder %v265_v22, %v273_v32 }
  0x64   : > { %v276_v33 = vsel %vm274_vm4, %v220_v2, 0.0  ;;  %v277_v34 = vsel %vm275_vm5, %v223_v4, 0.0 }
  0x65   : > { %v231_v20 = vrot.slane %v230_v18, 1  ;;  %v237_v21 = vmax.f32 %v235_v15, %v236_v19  ;;  %v278_v35 = vsel %vm225_vm1, %v276_v33, 0.0  ;;  %v285_v36 = vsel %vm225_vm1, %v277_v34, 0.0 }
  0x66   : > { %v279_v37 = vrot.slane %v278_v35, 4  ;;  %v286_v41 = vrot.slane %v285_v36, 4 }
  0x67   : > { %v232_v23 = vmax.f32 %v230_v18, %v231_v20  ;;  %v238_v24 = vrot.slane %v237_v21, 1 }
  0x68   : > { %v280_v44 = vadd.f32 %v279_v37, %v278_v35  ;;  %v287_v47 = vadd.f32 %v286_v41, %v285_v36 }
  0x69   : > { %v239_v25 = vmax.f32 %v237_v21, %v238_v24 }
  0x6a   : > { %v281_v50 = vrot.slane %v280_v44, 2  ;;  %v288_v53 = vrot.slane %v287_v47, 2 }
  0x6b   : > { %v242_v27 = vcombine.low %v232_v23, %v239_v25 }
  0x6c   : > { %v282_v56 = vadd.f32 %v281_v50, %v280_v44  ;;  %v289_v59 = vadd.f32 %v288_v53, %v287_v47 }
  0x6d   : > { %v244_v29 = vsub.f32 %v220_v2, %v242_v27  ;;  %v306_v2 = vunpack.c.l.s4 %v730_v1 }
  0x6e   : > { %v283_v61 = vrot.slane %v282_v56, 1  ;;  %v290_v62 = vrot.slane %v289_v59, 1 }
  0x6f   : > { %v245_v31 = vmul.f32 1.442695, %v244_v29  ;;  %v307_v8 = vunpack.c.0.s8 %v306_v2 }
  0x70   : > { %v284_v63 = vadd.f32 %v283_v61, %v282_v56  ;;  %v291_v0 = vadd.f32 %v290_v62, %v289_v59 }
  0x71   : > { %586 = vpow2.f32 %v245_v31  ;;  %v310_v13 = vsub.s32 %v307_v8, %v265_v22 }
  0x72   : > { %v293_v4 = vsub.f32 %v232_v23, %v284_v63  ;;  %v294_v6 = vsub.f32 %v239_v25, %v291_v0  ;;  %v362_v23 = vld [vmem:[#allocation3] sm:$0x3] (%p332_p9) }
  0x73   : > { %v367_v25 = vrot.slane (%p332_p9), %v362_v23, %v907_v26  ;;  %v371_v27 = vrot.slane (%p332_p9), %v362_v23, %v909_v28 }
  0x75   : > { %v374_v30 = vsel (%p332_p9), %vm349_vm6, %v367_v25, 0.0  ;;  %v375_v31 = vsel (%p332_p9), %vm349_vm6, %v371_v27, 0.0 }
  0x76   : > { %v376_v32 = vadd.f32 (%p332_p9), %v375_v31, %v374_v30 }
  0x7b   : > { %v587_v38 = vpop.eup %586 }
  0x7c   : > { %v248_v39 = vcombine.high %v587_v38, %v587_v38  ;;  %v250_v40 = vsel %vm225_vm1, %v587_v38, 0.0 }
  0x7d   : > { %v251_v42 = vrot.slane %v250_v40, 4 }
  0x7e   : > { %v257_v43 = vsel %vm225_vm1, %v248_v39, 0.0 }
  0x7f   : > { %v252_v45 = vadd.f32 %v251_v42, %v250_v40  ;;  %v258_v46 = vrot.slane %v257_v43, 4 }
  0x81   : > { %v253_v48 = vrot.slane %v252_v45, 2  ;;  %v259_v49 = vadd.f32 %v258_v46, %v257_v43 }
  0x83   : > { %v254_v51 = vadd.f32 %v253_v48, %v252_v45  ;;  %v260_v52 = vrot.slane %v259_v49, 2 }
  0x85   : > { %v255_v54 = vrot.slane %v254_v51, 1  ;;  %v261_v55 = vadd.f32 %v260_v52, %v259_v49 }
  0x87   : > { %v256_v57 = vadd.f32 %v255_v54, %v254_v51  ;;  %v262_v58 = vrot.slane %v261_v55, 1 }
  0x89   : > { %v263_v60 = vadd.f32 %v262_v58, %v261_v55  ;;  %588 = vlog2.f32 %v256_v57 }
  0x8b   : > { %590 = vlog2.f32 %v263_v60 }
  0x93   : > { %v589_v5 = vpop.eup %588 }
  0x94   : > { %v296_v7 = vmul.f32 0.6931472, %v589_v5 }
  0x95   : > { %v591_v9 = vpop.eup %590 }
  0x96   : > { %v298_v10 = vmul.f32 0.6931472, %v591_v9  ;;  %v299_v11 = vadd.f32 %v296_v7, %v293_v4 }
  0x98   : > { %v300_v12 = vadd.f32 %v298_v10, %v294_v6 }
  0x9a   : > { %v304_v14 = vcombine.low %v299_v11, %v300_v12 }
  0x9c   : > { %v311_v15 = vrot.slane %v304_v14, %v310_v13 }
  0x9d   : > { %336 = sbr.rel (!%p332_p9) target bundleno = 449 (0x1c1), region = 44 }
  0x9e   : > { %v318_v18 = vrot.slane %v311_v15, %v310_v13 }
  0xa0   : > { %v320_v19 = vsel %vm292_vm2, %v318_v18, 0.0 }
  0xa1   : > { %v321_v20 = vadd.f32 %v320_v19, %v301_v17 }
  0xa3   : > { %326 = vst.msk [vmem:[#allocation2] sm:$0x3] %vm901_vm3, %v321_v20 }
  0xaa   : > { %v337_v21 = vld [vmem:[#allocation2] sm:$0x3] }
  0xab   : > { %v342_v24 = vrot.slane %v337_v21, %v907_v26  ;;  %v346_v22 = vrot.slane %v337_v21, %v909_v28 }
  0xad   : > { %v350_v3 = vsel %vm349_vm6, %v342_v24, 0.0  ;;  %v351_v29 = vsel %vm349_vm6, %v346_v22, 0.0 }
  0xae   : > { %v352_v16 = vadd.f32 %v351_v29, %v350_v3 }
  0xb0   : > { %353 = vadd.xlane.f32.xlu0 %v352_v16 }
  0xb4   : > { %377 = vadd.xlane.f32.xlu0 %v376_v32 }
 0x13d   : > { %v354_v33 = vpop.xlane.xlu0 %353 }
 0x13e   : > { %v355_v34 = vrot.slane %v354_v33, 4 }
 0x140   : > { %v356_v35 = vadd.f32 %v355_v34, %v354_v33 }
 0x141   : > { %v378_v36 = vpop.xlane.xlu0 %377 }
 0x142   : > { %v357_v37 = vrot.slane %v356_v35, 2  ;;  %v379_v38 = vrot.slane %v378_v36, 4 }
 0x144   : > { %v380_v39 = vadd.f32 %v379_v38, %v378_v36  ;;  %v358_v40 = vadd.f32 %v357_v37, %v356_v35 }
 0x146   : > { %v381_v41 = vrot.slane %v380_v39, 2  ;;  %v359_v26 = vrot.slane %v358_v40, 1 }
 0x148   : > { %v382_v42 = vadd.f32 %v381_v41, %v380_v39  ;;  %v360_v28 = vadd.f32 %v359_v26, %v358_v40 }
 0x14a   : > { %509 = vpush %v360_v28  ;;  %v383_v43 = vrot.slane %v382_v42, 1 }
 0x14c   : > { %v384_v44 = vadd.f32 %v383_v43, %v382_v42 }
 0x14e   : > { %511 = vpush %v384_v44 }
 0x17b   : > { %s510_s12 = spop %509 }
 0x17f   : > { %s512_s20 = spop %511 }
 0x180   : > { %v386_v45 = vstv %s512_s20 }
 0x181   : > { %592 = vrcp.f32 %v386_v45 }
 0x18b   : > { %v593_v46 = vpop.eup %592 }
 0x18c   : > { %513 = vpush %v593_v46 }
 0x1bd   : > { %s514_s24 = spop %513 }
 0x1be   : > { %s389_s5 = smul.f32 %s514_s24, %s510_s12 }
 0x1c0   : > { %391 = sst [smem:[#allocation9]] %s389_s5 }
 0x1c1 PF: > { %p531_p6 = scmp.eq.s32.totalorder %s486_s15, 1  ;;  %s654_s8 = scalar_lea.hbm %s963_s2, 16 }
 0x1c2   : > { %p655_p2 = scmp.ne.s32.totalorder %s963_s2, %s654_s8  ;;  %p660_p1 = scmp.lt.u32.totalorder %s654_s8, %s963_s2 }
 0x1c4   : > { %p656_p3 = pnand %p655_p2, %p531_p6 }
 0x1c6   : > { %p657_p4 = pneg %p656_p3 }
 0x1c8   : > { %p662_p5 = pnand %p660_p1, %p657_p4 }
 0x1ca   : > { %665 = shalt.err (!%p662_p5)
}
 0x1cb   : > { %s731_s19 = smov [#allocation9]  }
 0x1cc   : > { %520 = dma.smem_to_hbm (%p531_p6), %s731_s19, 16, %s963_s2, [#allocation6]  }
 0x1cd   : > { %699 = dma.done.wait (%p531_p6), [#allocation6], 16  }
 0x1ce   : > { %701 = vsyncadd (%p531_p6), [#allocation6], 4294967280 }
 0x1cf   : > { %405 = sfence }
 0x1d0 PF: > { %s19_s14 = sadd.s32 1, %s724_s14   ;;  %s975_s9 = smov %s708_s10 }
 0x1d1   : > { %p16_p10 = scmp.ge.s32.totalorder %s19_s14, 4   ;;  %s976_s10 = smov %s712_s11 }
 0x1d2   : > { %s977_s11 = smov %s798_s21  ;;  %s978_s12 = smov %s720_s13 }
 0x1d3   : > { %s979_s13 = smov %s981_s16  ;;  %18 = sbr.rel (!%p16_p10) target bundleno = 7 (0x7), region = 87 }
 0x1da   :  { %411 = vsyncpa [#allocation5], 1 }
 0x1db   :  { %413 = vsyncpa [#allocation5 + $0x1], 1 }
 0x1dc   :  { %414 = vsyncpa [#allocation8], 1 }
 0x1dd   :  { %416 = vsyncpa [#allocation8 + $0x1], 1 }
 0x1de   :  { %417 = vsyncpa [#allocation6], 1 }
 0x1df   :  { %419 = vsyncpa [#allocation6 + $0x1], 1 }

</bundles_post_ra>
